<compile_context>
chip_gen: v6e
topology: v6e:2x2x1
jax: 0.10.0
libtpu: 0.0.40
codegen_flags: <defaults>
</compile_context>

<pallas_src>
import functools

import jax
import jax.numpy as jnp
from jax import lax
from jax.experimental import pallas as pl
from jax.experimental.pallas import tpu as pltpu


# splitmix32 constants expressed as int32 two's-complement Python ints.
_GOLDEN = -1640531527   # 0x9E3779B9
_MIX1 = 2146121005      # 0x7FEB352D
_MIX2 = -2073450869     # 0x846CA68B


def _splitmix32(z):
    """Counter-based 32-bit mix.  int32 only: wrap-around multiplies, and
    logical right shifts emulated as (arithmetic shift & mask)."""
    z = (z ^ ((z >> 16) & 0xFFFF)) * _MIX1
    z = (z ^ ((z >> 15) & 0x1FFFF)) * _MIX2
    z = z ^ ((z >> 16) & 0xFFFF)
    return z


def _actor_kernel(seed_ref,                                     # scalar prefetch (SMEM)
                  x_ref, w1_ref, b1_ref, w2_ref, b2_ref, w3_ref, b3_ref,
                  packed_ref, tmax_ref, targ_ref,               # outputs
                  *, num_actions, tile_b, batch):
    i = pl.program_id(0)
    A = num_actions

    # --- act_net: 2x (Linear + ReLU).  bf16 operands on the MXU, f32 accum.
    x = x_ref[...].astype(jnp.bfloat16)
    h1 = jnp.dot(x, w1_ref[...], preferred_element_type=jnp.float32) + b1_ref[...]
    h1 = jnp.maximum(h1, 0.0).astype(jnp.bfloat16)
    h2 = jnp.dot(h1, w2_ref[...], preferred_element_type=jnp.float32) + b2_ref[...]
    h2 = jnp.maximum(h2, 0.0).astype(jnp.bfloat16)

    # --- discrete_net: Linear + Softmax, as a stable (log-)softmax tail.
    logits = jnp.dot(h2, w3_ref[...], preferred_element_type=jnp.float32) + b3_ref[...]
    m = jnp.max(logits, axis=-1, keepdims=True)
    shifted = logits - m
    e = jnp.exp(shifted)
    s = jnp.sum(e, axis=-1, keepdims=True)
    probs = e / s                               # exact (feeds the global argmax)
    log_probs = shifted - jnp.log(s)            # exact log(softmax)

    # --- Categorical(probs).sample() via inverse-CDF: one uniform per row.
    rows1 = lax.broadcasted_iota(jnp.int32, (tile_b, 1), 0) + i * tile_b
    z = rows1 * _GOLDEN + seed_ref[0]
    bits = _splitmix32(z) & 0x007FFFFF
    u = bits.astype(jnp.float32) * jnp.float32(1.0 / (1 << 23)) \
        + jnp.float32(0.5 / (1 << 23))          # strictly in (0, 1)
    tk = lax.broadcasted_iota(jnp.int32, (A, A), 0)
    tj = lax.broadcasted_iota(jnp.int32, (A, A), 1)
    tri = (tk <= tj).astype(jnp.float32)        # tiny (A,A) lower-tri-transpose
    cum = jnp.dot(probs, tri, preferred_element_type=jnp.float32)
    action = jnp.minimum(
        jnp.sum((u > cum).astype(jnp.int32), axis=-1, keepdims=True),
        jnp.int32(A - 1))

    # --- One packed output slab per tile: [probs | log_probs | action].
    #     Slice stores (no concatenate); action is exactly representable in f32.
    packed_ref[:, :A] = probs
    packed_ref[:, A:2 * A] = log_probs
    packed_ref[:, 2 * A:] = action.astype(jnp.float32)

    # --- torch.argmax(action_probs) (flattened, no dim): per-tile max + first
    #     flat index of the max, written to a full (8,128) lane-dense block so
    #     the batch axis stays "parallel"; final O(num_tiles) reduce in wrapper.
    row = lax.broadcasted_iota(jnp.int32, (tile_b, A), 0) + i * tile_b
    col = lax.broadcasted_iota(jnp.int32, (tile_b, A), 1)
    if batch % tile_b != 0:
        pv = jnp.where(row < batch, probs, -jnp.inf)     # mask padded rows
    else:
        pv = probs
    flat_idx = row * A + col
    tile_max = jnp.max(pv)
    tile_arg = jnp.min(jnp.where(pv >= tile_max, flat_idx, jnp.int32(batch * A)))
    tmax_ref[...] = jnp.full((1, 8, 128), tile_max, jnp.float32)
    targ_ref[...] = jnp.full((1, 8, 128), tile_arg, jnp.int32)


def base_actor_forward(state, params, seed, tile_b=None):
    """Returns (action, (action_probs, log_action_probs), max_probability_action)."""
    w1, b1, w2, b2, w3, b3 = params
    B, S = state.shape
    A = w3.shape[1]

    if tile_b is None:
        # Large tiles amortize per-grid-step overhead; at these feature dims a
        # 4096-row tile (double-buffered) is only ~1-2 MiB of VMEM, far below
        # even v7x's 64 MiB.
        tile_b = B if B <= 4096 else 4096
    num_tiles = -(-B // tile_b)
    Bp = num_tiles * tile_b
    if Bp != B:
        # Fallback only for ragged batches (typical RL batch sizes divide evenly).
        state = jnp.pad(state, ((0, Bp - B), (0, 0)))

    kernel = functools.partial(_actor_kernel, num_actions=A, tile_b=tile_b, batch=B)
    W = 2 * A + 1  # probs | log_probs | action

    grid_spec = pltpu.PrefetchScalarGridSpec(
        num_scalar_prefetch=1,
        grid=(num_tiles,),
        in_specs=[
            pl.BlockSpec((tile_b, S), lambda i, s: (i, 0)),
            # Weights/biases: constant index_map -> VMEM-resident, no re-DMA.
            pl.BlockSpec(w1.shape, lambda i, s: (0, 0)),
            pl.BlockSpec(b1.shape, lambda i, s: (0, 0)),
            pl.BlockSpec(w2.shape, lambda i, s: (0, 0)),
            pl.BlockSpec(b2.shape, lambda i, s: (0, 0)),
            pl.BlockSpec(w3.shape, lambda i, s: (0, 0)),
            pl.BlockSpec(b3.shape, lambda i, s: (0, 0)),
        ],
        out_specs=(
            pl.BlockSpec((tile_b, W), lambda i, s: (i, 0)),        # packed slab
            pl.BlockSpec((1, 8, 128), lambda i, s: (i, 0, 0)),     # per-tile max
            pl.BlockSpec((1, 8, 128), lambda i, s: (i, 0, 0)),     # per-tile arg
        ),
    )

    packed, tmax, targ = pl.pallas_call(
        kernel,
        grid_spec=grid_spec,
        out_shape=(
            jax.ShapeDtypeStruct((Bp, W), jnp.float32),
            jax.ShapeDtypeStruct((num_tiles, 8, 128), jnp.float32),
            jax.ShapeDtypeStruct((num_tiles, 8, 128), jnp.int32),
        ),
        compiler_params=pltpu.CompilerParams(
            # No cross-tile carry anymore -> batch axis is "parallel"
            # (dual-TC on v7x); explicit VMEM budget with plenty of headroom.
            dimension_semantics=("parallel",),
            vmem_limit_bytes=32 * 1024 * 1024,
        ),
    )(jnp.full((1,), seed, dtype=jnp.int32), state, w1, b1, w2, b2, w3, b3)

    action_probs = packed[:B, :A]
    log_action_probs = packed[:B, A:2 * A]
    action = packed[:B, 2 * A].astype(jnp.int32)

    tile_maxes = tmax[:, 0, 0]
    tile_args = targ[:, 0, 0]
    best_tile = jnp.argmax(tile_maxes)            # first-occurrence tie-break
    max_probability_action = tile_args[best_tile]
    return action, (action_probs, log_action_probs), max_probability_action


def init_params(key, state_dim, hidden, num_actions):
    ks = jax.random.split(key, 6)
    scale = 0.1
    w1 = (scale * jax.random.normal(ks[0], (state_dim, hidden), jnp.float32)).astype(jnp.bfloat16)
    b1 = scale * jax.random.normal(ks[1], (1, hidden), jnp.float32)
    w2 = (scale * jax.random.normal(ks[2], (hidden, hidden), jnp.float32)).astype(jnp.bfloat16)
    b2 = scale * jax.random.normal(ks[3], (1, hidden), jnp.float32)
    w3 = (scale * jax.random.normal(ks[4], (hidden, num_actions), jnp.float32)).astype(jnp.bfloat16)
    b3 = scale * jax.random.normal(ks[5], (1, num_actions), jnp.float32)
    return w1, b1, w2, b2, w3, b3


def reference_forward(state, params):
    """Pure-JAX replica of the PyTorch forward (probs / log_probs only)."""
    w1, b1, w2, b2, w3, b3 = params
    x = state.astype(jnp.bfloat16)
    h1 = jnp.maximum(jnp.dot(x, w1, preferred_element_type=jnp.float32) + b1, 0.0).astype(jnp.bfloat16)
    h2 = jnp.maximum(jnp.dot(h1, w2, preferred_element_type=jnp.float32) + b2, 0.0).astype(jnp.bfloat16)
    logits = jnp.dot(h2, w3, preferred_element_type=jnp.float32) + b3
    probs = jax.nn.softmax(logits, axis=-1)
    logp = jnp.log(probs + (probs == 0.0) * 1e-8)
    return probs, logp


if __name__ == "__main__":
    B, STATE_DIM, HIDDEN, NUM_ACTIONS = 2, 16, 32, 8   # discrete_net_input = HIDDEN

    root = jax.random.PRNGKey(0)
    k_param, k_state = jax.random.split(root, 2)

    params = init_params(k_param, STATE_DIM, HIDDEN, NUM_ACTIONS)
    state = jax.random.normal(k_state, (B, STATE_DIM), jnp.float32)

    action, (probs, log_probs), max_act = base_actor_forward(state, params, seed=1234)
    jax.block_until_ready((action, probs, log_probs, max_act))

    # --- sanity checks ---
    assert probs.shape == (B, NUM_ACTIONS) and log_probs.shape == (B, NUM_ACTIONS)
    assert action.shape == (B,) and action.dtype == jnp.int32
    assert bool(jnp.all((action >= 0) & (action < NUM_ACTIONS)))
    assert 0 <= int(max_act) < B * NUM_ACTIONS
    # flattened argmax must match argmax over the kernel's own probs output
    assert int(max_act) == int(jnp.argmax(probs))
    # rows of probs sum to 1 (exact division -> tight tolerance)
    assert jnp.allclose(jnp.sum(probs, axis=-1), 1.0, atol=1e-5)
    # matches the pure-JAX replica of the PyTorch forward
    ref_p, ref_lp = reference_forward(state, params)
    assert jnp.allclose(probs, ref_p, atol=5e-3)
    assert jnp.allclose(log_probs, ref_lp, atol=5e-3)

    # TODO(synk): torch.argmax with no dim is a single global index over the
    # flattened probs tensor (only meaningful for batch=1); reproduced as-is.
    # TODO(synk): Categorical.sample() uses an in-kernel counter-based PRNG
    # (splitmix32 + inverse-CDF); distributionally correct but not bit-identical
    # to torch's RNG stream.

    print("KERNEL_OK")
</pallas_src>

<mosaic_0001>
module attributes {stable_mosaic.version = 11 : i64} {
  func.func @_actor_kernel(%arg0: i32, %arg1: memref<1xi32, #tpu.memory_space<smem>>, %arg2: memref<2x16xf32, #tpu.memory_space<vmem>>, %arg3: memref<16x32xbf16, #tpu.memory_space<vmem>>, %arg4: memref<1x32xf32, #tpu.memory_space<vmem>>, %arg5: memref<32x32xbf16, #tpu.memory_space<vmem>>, %arg6: memref<1x32xf32, #tpu.memory_space<vmem>>, %arg7: memref<32x8xbf16, #tpu.memory_space<vmem>>, %arg8: memref<1x8xf32, #tpu.memory_space<vmem>>, %arg9: memref<2x17xf32, #tpu.memory_space<vmem>>, %arg10: memref<1x8x128xf32, #tpu.memory_space<vmem>>, %arg11: memref<1x8x128xi32, #tpu.memory_space<vmem>>) attributes {dimension_semantics = [#tpu.dimension_semantics<parallel>], iteration_bounds = array<i64: 1>, scalar_prefetch = 1 : i64, scratch_operands = 0 : i64, tpu.core_type = #tpu.core_type<tc>, window_params = [{transform_indices = @transform_0, window_bounds = array<i64: 2, 16>}, {pipeline_mode = #tpu.pipeline_mode<synchronous>, transform_indices = @transform_1, window_bounds = array<i64: 16, 32>}, {pipeline_mode = #tpu.pipeline_mode<synchronous>, transform_indices = @transform_2, window_bounds = array<i64: 1, 32>}, {pipeline_mode = #tpu.pipeline_mode<synchronous>, transform_indices = @transform_3, window_bounds = array<i64: 32, 32>}, {pipeline_mode = #tpu.pipeline_mode<synchronous>, transform_indices = @transform_4, window_bounds = array<i64: 1, 32>}, {pipeline_mode = #tpu.pipeline_mode<synchronous>, transform_indices = @transform_5, window_bounds = array<i64: 32, 8>}, {pipeline_mode = #tpu.pipeline_mode<synchronous>, transform_indices = @transform_6, window_bounds = array<i64: 1, 8>}, {transform_indices = @transform_7, window_bounds = array<i64: 2, 17>}, {transform_indices = @transform_8, window_bounds = array<i64: 1, 8, 128>}, {transform_indices = @transform_9, window_bounds = array<i64: 1, 8, 128>}]} {
    %c0 = arith.constant 0 : index
    %c0_0 = arith.constant 0 : index
    %0 = vector.load %arg2[%c0, %c0_0] : memref<2x16xf32, #tpu.memory_space<vmem>>, vector<2x16xf32>
    %1 = arith.truncf %0 : vector<2x16xf32> to vector<2x16xbf16>
    %c0_1 = arith.constant 0 : index
    %c0_2 = arith.constant 0 : index
    %2 = vector.load %arg3[%c0_1, %c0_2] : memref<16x32xbf16, #tpu.memory_space<vmem>>, vector<16x32xbf16>
    %cst = arith.constant dense<0.000000e+00> : vector<2x32xf32>
    %3 = tpu.matmul %1, %2, %cst {dimension_numbers = #tpu.dot_dimension_numbers<[1], [0], [0], [1], [0, 0, 1, 1], [], []>} : vector<2x16xbf16>, vector<16x32xbf16>, vector<2x32xf32> -> vector<2x32xf32>
    %c0_3 = arith.constant 0 : index
    %c0_4 = arith.constant 0 : index
    %4 = vector.load %arg4[%c0_3, %c0_4] : memref<1x32xf32, #tpu.memory_space<vmem>>, vector<1x32xf32>
    %5 = vector.broadcast %4 : vector<1x32xf32> to vector<2x32xf32>
    %6 = arith.addf %3, %5 : vector<2x32xf32>
    %cst_5 = arith.constant 0.000000e+00 : f32
    %7 = vector.broadcast %cst_5 : f32 to vector<2x32xf32>
    %8 = arith.maximumf %6, %7 : vector<2x32xf32>
    %9 = arith.truncf %8 : vector<2x32xf32> to vector<2x32xbf16>
    %c0_6 = arith.constant 0 : index
    %c0_7 = arith.constant 0 : index
    %10 = vector.load %arg5[%c0_6, %c0_7] : memref<32x32xbf16, #tpu.memory_space<vmem>>, vector<32x32xbf16>
    %cst_8 = arith.constant dense<0.000000e+00> : vector<2x32xf32>
    %11 = tpu.matmul %9, %10, %cst_8 {dimension_numbers = #tpu.dot_dimension_numbers<[1], [0], [0], [1], [0, 0, 1, 1], [], []>} : vector<2x32xbf16>, vector<32x32xbf16>, vector<2x32xf32> -> vector<2x32xf32>
    %c0_9 = arith.constant 0 : index
    %c0_10 = arith.constant 0 : index
    %12 = vector.load %arg6[%c0_9, %c0_10] : memref<1x32xf32, #tpu.memory_space<vmem>>, vector<1x32xf32>
    %13 = vector.broadcast %12 : vector<1x32xf32> to vector<2x32xf32>
    %14 = arith.addf %11, %13 : vector<2x32xf32>
    %cst_11 = arith.constant 0.000000e+00 : f32
    %15 = vector.broadcast %cst_11 : f32 to vector<2x32xf32>
    %16 = arith.maximumf %14, %15 : vector<2x32xf32>
    %17 = arith.truncf %16 : vector<2x32xf32> to vector<2x32xbf16>
    %c0_12 = arith.constant 0 : index
    %c0_13 = arith.constant 0 : index
    %18 = vector.load %arg7[%c0_12, %c0_13] : memref<32x8xbf16, #tpu.memory_space<vmem>>, vector<32x8xbf16>
    %cst_14 = arith.constant dense<0.000000e+00> : vector<2x8xf32>
    %19 = tpu.matmul %17, %18, %cst_14 {dimension_numbers = #tpu.dot_dimension_numbers<[1], [0], [0], [1], [0, 0, 1, 1], [], []>} : vector<2x32xbf16>, vector<32x8xbf16>, vector<2x8xf32> -> vector<2x8xf32>
    %c0_15 = arith.constant 0 : index
    %c0_16 = arith.constant 0 : index
    %20 = vector.load %arg8[%c0_15, %c0_16] : memref<1x8xf32, #tpu.memory_space<vmem>>, vector<1x8xf32>
    %21 = vector.broadcast %20 : vector<1x8xf32> to vector<2x8xf32>
    %22 = arith.addf %19, %21 : vector<2x8xf32>
    %cst_17 = arith.constant dense<0xFF800000> : vector<2xf32>
    %23 = vector.multi_reduction <maximumf>, %22, %cst_17 [1] : vector<2x8xf32> to vector<2xf32>
    %24 = vector.shape_cast %23 : vector<2xf32> to vector<2x1xf32>
    %25 = vector.broadcast %24 : vector<2x1xf32> to vector<2x8xf32>
    %26 = arith.subf %22, %25 : vector<2x8xf32>
    %27 = math.exp %26 : vector<2x8xf32>
    %cst_18 = arith.constant dense<0.000000e+00> : vector<2xf32>
    %28 = vector.multi_reduction <add>, %27, %cst_18 [1] : vector<2x8xf32> to vector<2xf32>
    %29 = vector.shape_cast %28 : vector<2xf32> to vector<2x1xf32>
    %30 = vector.broadcast %29 : vector<2x1xf32> to vector<2x8xf32>
    %31 = arith.divf %27, %30 : vector<2x8xf32>
    %32 = math.log %29 : vector<2x1xf32>
    %33 = vector.broadcast %32 : vector<2x1xf32> to vector<2x8xf32>
    %34 = arith.subf %26, %33 : vector<2x8xf32>
    %35 = tpu.iota {dimensions = array<i32: 0>} : vector<2x1xi32>
    %c2_i32 = arith.constant 2 : i32
    %36 = arith.muli %arg0, %c2_i32 : i32
    %37 = vector.broadcast %36 : i32 to vector<2x1xi32>
    %38 = arith.addi %35, %37 : vector<2x1xi32>
    %c-1640531527_i32 = arith.constant -1640531527 : i32
    %39 = vector.broadcast %c-1640531527_i32 : i32 to vector<2x1xi32>
    %40 = arith.muli %38, %39 : vector<2x1xi32>
    %c0_19 = arith.constant 0 : index
    %41 = memref.load %arg1[%c0_19] : memref<1xi32, #tpu.memory_space<smem>>
    %42 = vector.broadcast %41 : i32 to vector<2x1xi32>
    %43 = arith.addi %40, %42 : vector<2x1xi32>
    %c16_i32 = arith.constant 16 : i32
    %44 = vector.broadcast %c16_i32 : i32 to vector<2x1xi32>
    %45 = arith.shrsi %43, %44 : vector<2x1xi32>
    %c65535_i32 = arith.constant 65535 : i32
    %46 = vector.broadcast %c65535_i32 : i32 to vector<2x1xi32>
    %47 = arith.andi %45, %46 : vector<2x1xi32>
    %48 = arith.xori %43, %47 : vector<2x1xi32>
    %c2146121005_i32 = arith.constant 2146121005 : i32
    %49 = vector.broadcast %c2146121005_i32 : i32 to vector<2x1xi32>
    %50 = arith.muli %48, %49 : vector<2x1xi32>
    %c15_i32 = arith.constant 15 : i32
    %51 = vector.broadcast %c15_i32 : i32 to vector<2x1xi32>
    %52 = arith.shrsi %50, %51 : vector<2x1xi32>
    %c131071_i32 = arith.constant 131071 : i32
    %53 = vector.broadcast %c131071_i32 : i32 to vector<2x1xi32>
    %54 = arith.andi %52, %53 : vector<2x1xi32>
    %55 = arith.xori %50, %54 : vector<2x1xi32>
    %c-2073450869_i32 = arith.constant -2073450869 : i32
    %56 = vector.broadcast %c-2073450869_i32 : i32 to vector<2x1xi32>
    %57 = arith.muli %55, %56 : vector<2x1xi32>
    %c16_i32_20 = arith.constant 16 : i32
    %58 = vector.broadcast %c16_i32_20 : i32 to vector<2x1xi32>
    %59 = arith.shrsi %57, %58 : vector<2x1xi32>
    %c65535_i32_21 = arith.constant 65535 : i32
    %60 = vector.broadcast %c65535_i32_21 : i32 to vector<2x1xi32>
    %61 = arith.andi %59, %60 : vector<2x1xi32>
    %62 = arith.xori %57, %61 : vector<2x1xi32>
    %c8388607_i32 = arith.constant 8388607 : i32
    %63 = vector.broadcast %c8388607_i32 : i32 to vector<2x1xi32>
    %64 = arith.andi %62, %63 : vector<2x1xi32>
    %65 = arith.sitofp %64 : vector<2x1xi32> to vector<2x1xf32>
    %cst_22 = arith.constant 1.1920929E-7 : f32
    %66 = vector.broadcast %cst_22 : f32 to vector<2x1xf32>
    %67 = arith.mulf %65, %66 : vector<2x1xf32>
    %cst_23 = arith.constant 5.96046448E-8 : f32
    %68 = vector.broadcast %cst_23 : f32 to vector<2x1xf32>
    %69 = arith.addf %67, %68 : vector<2x1xf32>
    %70 = tpu.iota {dimensions = array<i32: 0>} : vector<8x8xi32>
    %71 = tpu.iota {dimensions = array<i32: 1>} : vector<8x8xi32>
    %72 = arith.cmpi sle, %70, %71 : vector<8x8xi32>
    %73 = arith.extui %72 : vector<8x8xi1> to vector<8x8xi32>
    %74 = arith.sitofp %73 : vector<8x8xi32> to vector<8x8xf32>
    %cst_24 = arith.constant dense<0.000000e+00> : vector<2x8xf32>
    %75 = tpu.matmul %31, %74, %cst_24 {dimension_numbers = #tpu.dot_dimension_numbers<[1], [0], [0], [1], [0, 0, 1, 1], [], []>} : vector<2x8xf32>, vector<8x8xf32>, vector<2x8xf32> -> vector<2x8xf32>
    %76 = vector.broadcast %69 : vector<2x1xf32> to vector<2x8xf32>
    %77 = arith.cmpf ogt, %76, %75 : vector<2x8xf32>
    %78 = arith.extui %77 : vector<2x8xi1> to vector<2x8xi32>
    %cst_25 = arith.constant dense<0> : vector<2xi32>
    %79 = vector.multi_reduction <add>, %78, %cst_25 [1] : vector<2x8xi32> to vector<2xi32>
    %80 = vector.shape_cast %79 : vector<2xi32> to vector<2x1xi32>
    %c7_i32 = arith.constant 7 : i32
    %81 = vector.broadcast %c7_i32 : i32 to vector<2x1xi32>
    %82 = arith.minsi %80, %81 : vector<2x1xi32>
    %c0_26 = arith.constant 0 : index
    %c0_27 = arith.constant 0 : index
    %83 = vector.load %arg9[%c0_26, %c0_27] : memref<2x17xf32, #tpu.memory_space<vmem>>, vector<2x8xf32>
    tpu.vector_store %arg9[%c0_26, %c0_27], %31 {strides = array<i32>} : memref<2x17xf32, #tpu.memory_space<vmem>>, vector<2x8xf32>,
    %c0_28 = arith.constant 0 : index
    %c8 = arith.constant 8 : index
    %84 = vector.load %arg9[%c0_28, %c8] : memref<2x17xf32, #tpu.memory_space<vmem>>, vector<2x8xf32>
    tpu.vector_store %arg9[%c0_28, %c8], %34 {strides = array<i32>} : memref<2x17xf32, #tpu.memory_space<vmem>>, vector<2x8xf32>,
    %85 = arith.sitofp %82 : vector<2x1xi32> to vector<2x1xf32>
    %c0_29 = arith.constant 0 : index
    %c16 = arith.constant 16 : index
    %86 = vector.load %arg9[%c0_29, %c16] : memref<2x17xf32, #tpu.memory_space<vmem>>, vector<2x1xf32>
    tpu.vector_store %arg9[%c0_29, %c16], %85 {strides = array<i32>} : memref<2x17xf32, #tpu.memory_space<vmem>>, vector<2x1xf32>,
    %87 = tpu.iota {dimensions = array<i32: 0>} : vector<2x8xi32>
    %c2_i32_30 = arith.constant 2 : i32
    %88 = arith.muli %arg0, %c2_i32_30 : i32
    %89 = vector.broadcast %88 : i32 to vector<2x8xi32>
    %90 = arith.addi %87, %89 : vector<2x8xi32>
    %91 = tpu.iota {dimensions = array<i32: 1>} : vector<2x8xi32>
    %c8_i32 = arith.constant 8 : i32
    %92 = vector.broadcast %c8_i32 : i32 to vector<2x8xi32>
    %93 = arith.muli %90, %92 : vector<2x8xi32>
    %94 = arith.addi %93, %91 : vector<2x8xi32>
    %95 = vector.shape_cast %31 : vector<2x8xf32> to vector<1x2x8xf32>
    %cst_31 = arith.constant dense<0xFF800000> : vector<1xf32>
    %96 = vector.multi_reduction <maximumf>, %95, %cst_31 [1, 2] : vector<1x2x8xf32> to vector<1xf32>
    %97 = vector.shape_cast %96 : vector<1xf32> to vector<1x1x1xf32>
    %98 = vector.extract %97[0, 0, 0] : f32 from vector<1x1x1xf32>
    %99 = vector.broadcast %98 : f32 to vector<2x8xf32>
    %100 = arith.cmpf oge, %31, %99 : vector<2x8xf32>
    %c16_i32_32 = arith.constant 16 : i32
    %101 = vector.broadcast %c16_i32_32 : i32 to vector<2x8xi32>
    %102 = arith.select %100, %94, %101 : vector<2x8xi1>, vector<2x8xi32>
    %103 = vector.shape_cast %102 : vector<2x8xi32> to vector<1x2x8xi32>
    %cst_33 = arith.constant dense<2147483647> : vector<1xi32>
    %104 = vector.multi_reduction <minsi>, %103, %cst_33 [1, 2] : vector<1x2x8xi32> to vector<1xi32>
    %105 = vector.shape_cast %104 : vector<1xi32> to vector<1x1x1xi32>
    %106 = vector.extract %105[0, 0, 0] : i32 from vector<1x1x1xi32>
    %107 = vector.broadcast %98 : f32 to vector<1x8x128xf32>
    %c0_34 = arith.constant 0 : index
    %c0_35 = arith.constant 0 : index
    %c0_36 = arith.constant 0 : index
    %108 = vector.load %arg10[%c0_34, %c0_35, %c0_36] : memref<1x8x128xf32, #tpu.memory_space<vmem>>, vector<1x8x128xf32>
    tpu.vector_store %arg10[%c0_34, %c0_35, %c0_36], %107 {strides = array<i32>} : memref<1x8x128xf32, #tpu.memory_space<vmem>>, vector<1x8x128xf32>,
    %109 = vector.broadcast %106 : i32 to vector<1x8x128xi32>
    %c0_37 = arith.constant 0 : index
    %c0_38 = arith.constant 0 : index
    %c0_39 = arith.constant 0 : index
    %110 = vector.load %arg11[%c0_37, %c0_38, %c0_39] : memref<1x8x128xi32, #tpu.memory_space<vmem>>, vector<1x8x128xi32>
    tpu.vector_store %arg11[%c0_37, %c0_38, %c0_39], %109 {strides = array<i32>} : memref<1x8x128xi32, #tpu.memory_space<vmem>>, vector<1x8x128xi32>,
    return
  }
  func.func @transform_0(%arg0: i32, %arg1: memref<1xi32, #tpu.memory_space<smem>>) -> (i32, i32) {
    %c0_i32 = arith.constant 0 : i32
    %c0_i32_0 = arith.constant 0 : i32
    return %arg0, %c0_i32 : i32, i32
  }
  func.func @transform_1(%arg0: i32, %arg1: memref<1xi32, #tpu.memory_space<smem>>) -> (i32, i32) {
    %c0_i32 = arith.constant 0 : i32
    %c0_i32_0 = arith.constant 0 : i32
    %c0_i32_1 = arith.constant 0 : i32
    return %c0_i32, %c0_i32_0 : i32, i32
  }
  func.func @transform_2(%arg0: i32, %arg1: memref<1xi32, #tpu.memory_space<smem>>) -> (i32, i32) {
    %c0_i32 = arith.constant 0 : i32
    %c0_i32_0 = arith.constant 0 : i32
    %c0_i32_1 = arith.constant 0 : i32
    return %c0_i32, %c0_i32_0 : i32, i32
  }
  func.func @transform_3(%arg0: i32, %arg1: memref<1xi32, #tpu.memory_space<smem>>) -> (i32, i32) {
    %c0_i32 = arith.constant 0 : i32
    %c0_i32_0 = arith.constant 0 : i32
    %c0_i32_1 = arith.constant 0 : i32
    return %c0_i32, %c0_i32_0 : i32, i32
  }
  func.func @transform_4(%arg0: i32, %arg1: memref<1xi32, #tpu.memory_space<smem>>) -> (i32, i32) {
    %c0_i32 = arith.constant 0 : i32
    %c0_i32_0 = arith.constant 0 : i32
    %c0_i32_1 = arith.constant 0 : i32
    return %c0_i32, %c0_i32_0 : i32, i32
  }
  func.func @transform_5(%arg0: i32, %arg1: memref<1xi32, #tpu.memory_space<smem>>) -> (i32, i32) {
    %c0_i32 = arith.constant 0 : i32
    %c0_i32_0 = arith.constant 0 : i32
    %c0_i32_1 = arith.constant 0 : i32
    return %c0_i32, %c0_i32_0 : i32, i32
  }
  func.func @transform_6(%arg0: i32, %arg1: memref<1xi32, #tpu.memory_space<smem>>) -> (i32, i32) {
    %c0_i32 = arith.constant 0 : i32
    %c0_i32_0 = arith.constant 0 : i32
    %c0_i32_1 = arith.constant 0 : i32
    return %c0_i32, %c0_i32_0 : i32, i32
  }
  func.func @transform_7(%arg0: i32, %arg1: memref<1xi32, #tpu.memory_space<smem>>) -> (i32, i32) {
    %c0_i32 = arith.constant 0 : i32
    %c0_i32_0 = arith.constant 0 : i32
    return %arg0, %c0_i32 : i32, i32
  }
  func.func @transform_8(%arg0: i32, %arg1: memref<1xi32, #tpu.memory_space<smem>>) -> (i32, i32, i32) {
    %c0_i32 = arith.constant 0 : i32
    %c0_i32_0 = arith.constant 0 : i32
    %c0_i32_1 = arith.constant 0 : i32
    return %arg0, %c0_i32, %c0_i32_0 : i32, i32, i32
  }
  func.func @transform_9(%arg0: i32, %arg1: memref<1xi32, #tpu.memory_space<smem>>) -> (i32, i32, i32) {
    %c0_i32 = arith.constant 0 : i32
    %c0_i32_0 = arith.constant 0 : i32
    %c0_i32_1 = arith.constant 0 : i32
    return %arg0, %c0_i32, %c0_i32_0 : i32, i32, i32
  }
}

</mosaic_0001>

<bundles_post_ra>
// kernel: tpu_custom_call.1
= control target key start
LH: loop header
LB: loop body
LE: loop exit
PB: predicated region body
PF: predicated region fallthrough
CT: control target
= control target key end

     0   :  { %17 = vsyncpa [#allocation5], 0  ;;  %s792_s0 = inlined_call_operand.<no memory space> [shape: s32[1], index: 0, kind: input, shape index: {}]   ;;  %s793_s1 = inlined_call_operand.hbm [shape: f32[2,16], index: 1, kind: input, shape index: {}]   ;;  %s794_s2 = inlined_call_operand.vmem [shape: bf16[16,32], index: 2, kind: input, shape index: {}]   ;;  %s795_s3 = inlined_call_operand.vmem [shape: f32[1,32], index: 3, kind: input, shape index: {}]   ;;  %s796_s4 = inlined_call_operand.vmem [shape: bf16[32,32], index: 4, kind: input, shape index: {}]   ;;  %s797_s5 = inlined_call_operand.hbm [shape: f32[1,32], index: 5, kind: input, shape index: {}]   ;;  %s798_s6 = inlined_call_operand.vmem [shape: bf16[32,8], index: 6, kind: input, shape index: {}]   ;;  %s799_s7 = inlined_call_operand.vmem [shape: f32[1,8], index: 7, kind: input, shape index: {}]   ;;  %s800_s8 = inlined_call_operand.hbm [shape: f32[2,17], index: 8, kind: output, shape index: {0}]   ;;  %s801_s9 = inlined_call_operand.hbm [shape: f32[1,8,128], index: 9, kind: output, shape index: {1}]   ;;  %s802_s10 = inlined_call_operand.hbm [shape: s32[1,8,128], index: 10, kind: output, shape index: {2}]  }
   0x1   :  { %18 = vsyncpa [#allocation8], 0 }
   0x2   :  { %19 = vsyncpa [#allocation6], 0 }
   0x3   :  { %20 = vsyncpa [#allocation11], 0  ;;  %s674_s13 = smov [#allocation4]   ;;  %s675_s15 = smov [#allocation7]  }
   0x4   :  { %s27_s14 = sshll.u32 %s674_s13, 4  ;;  %s43_s16 = sshll.u32 %s675_s15, 4  ;;  %s28_s14 = int_to_ptr.vmem [resolvable:$true] %s27_s14  ;;  %s44_s16 = int_to_ptr.vmem [resolvable:$true] %s43_s16 }
   0x5   :  { %s574_s17 = scalar_lea.vmem %s28_s14, 32  ;;  %p579_p1 = scmp.lt.s32.totalorder %s28_s14, %s28_s14 }
   0x6   :  { %p575_p0 = scmp.ne.s32.totalorder %s28_s14, %s574_s17  ;;  %p580_p2 = scmp.lt.s32.totalorder %s574_s17, %s574_s17 }
   0x8   :  { %p581_p3 = por %p580_p2, %p579_p1 }
   0xa   :  { %p582_p4 = pnand %p581_p3, %p575_p0 }
   0xc   :  { %585 = shalt.err (!%p582_p4)
}
   0xd   :  { %30 = dma.hbm_to_vmem [thread:$0]  %s793_s1, 32, %s28_s14, [#allocation5]  }
   0xe   :  { %s594_s20 = scalar_lea.vmem %s44_s16, 16  ;;  %s598_s21 = scalar_lea.vmem %s44_s16, 32 }
   0xf   :  { %p595_p5 = scmp.ne.s32.totalorder %s44_s16, %s594_s20  ;;  %p599_p6 = scmp.lt.s32.totalorder %s44_s16, %s44_s16 }
  0x10   :  { %p600_p7 = scmp.lt.s32.totalorder %s598_s21, %s594_s20 }
  0x12   :  { %p601_p8 = por %p600_p7, %p599_p6 }
  0x14   :  { %p602_p9 = pnand %p601_p8, %p595_p5 }
  0x16   :  { %605 = shalt.err (!%p602_p9)
}
  0x17   :  { %46 = dma.hbm_to_vmem [thread:$0]  %s797_s5, 16, %s44_s16, [#allocation8]  }
  0x18   :  { %666 = dma.done.wait [#allocation5], 32  }
  0x19   :  { %667 = vsyncadd [#allocation5], 4294967264 }
  0x1a   :  { %668 = dma.done.wait [#allocation8], 16  }
  0x1b   :  { %669 = vsyncadd [#allocation8], 4294967280  ;;  %v676_v0 = vmov 0.0   ;;  %vm677_vm0 = vmmov 0   ;;  %v555_v1 = vld [vmem:[%s794_s2] sm:$0xff]   ;;  %vm75_vm1 = vcmask 130048   ;;  %v271_v36 = vlaneseq }
  0x1c   :  { %514 = vmatprep.subr.bf16.mxu0 %v676_v0  ;;  %516 = vmatprep.mubr.msk.bf16.mxu0 %vm677_vm0, %v676_v0  ;;  %v58_v2 = vld [vmem:[#allocation4] sm:$0x3]  ;;  %v556_v4 = vld [vmem:[%s796_s4 + $0x8] sm:$0xff]   ;;  %vm144_vm2 = vcmask 261120   ;;  %v490_v16 = vld [vmem:[#allocation7] ss:$0 sm:$0xff]  ;;  %v278_v49 = vstv %s792_s0 }
  0x1d   :  { %520 = vmatprep.subr.bf16.mxu1 %v676_v0  ;;  %524 = vmatprep.mubr.msk.bf16.mxu1 %vm677_vm0, %v676_v0  ;;  %v59_v3 = vpack.c.bf16 %v58_v2, %v58_v2  ;;  %v557_v5 = vld [vmem:[%s796_s4] sm:$0xff]   ;;  %v558_v6 = vld [vmem:[%s798_s6 + $0x8] sm:$0xff]   ;;  %vm256_vm3 = vcmask 58368   ;;  %v272_v37 = vshrl.u32 %v271_v36, 7  ;;  %v296_v38 = vand.u32 127, %v271_v36  ;;  %s680_s13 = smov 8  }
  0x1e   :  { %515 = vmatpush3.bf16.msra.mxu0 %v555_v1  ;;  %521 = vmatpush3.bf16.msra.mxu1 %v556_v4  ;;  %v487_v7 = vld [vmem:[%s795_s3] ss:$0 sm:$0xff]  ;;  %v678_v39 = vmov 1.0   ;;  %vm300_vm5 = vcmask 64512   ;;  %vm396_vm9 = vcmask 123968   ;;  %s681_s14 = smov [#allocation10]  }
  0x1f   :  { %528 = vmatprep.subr.bf16.mxu0 %v676_v0  ;;  %522 = vmatprep.subr.bf16.mxu1 %v676_v0  ;;  %v559_v15 = vld [vmem:[%s798_s6] sm:$0xff]   ;;  %vm297_vm4 = vcmp.le.s32.totalorder %v272_v37, %v296_v38  ;;  %v276_v47 = vmul.u32 2654435769, %v272_v37  ;;  %v401_v4 = vmul.u32 8, %v272_v37  ;;  %s460_s15 = sshll.u32 %s681_s14, 4  ;;  %s461_s15 = int_to_ptr.vmem [resolvable:$true] %s460_s15 }
  0x20   :  { %v494_v24 = vld [vmem:[%s799_s7] ss:$0 sm:$0xff]  ;;  %s606_s16 = scalar_lea.vmem %s461_s15, 128  ;;  %p611_p11 = scmp.lt.s32.totalorder %s461_s15, %s461_s15 }
  0x21   :  { %517 = vmatmul.mubr.msk.bf16.vlgmr.msra.gmra.mxu0 %vm75_vm1, %v59_v3  ;;  %v279_v51 = vadd.s32 %v278_v49, %v276_v47  ;;  %p607_p10 = scmp.ne.s32.totalorder %s461_s15, %s606_s16  ;;  %p612_p12 = scmp.lt.s32.totalorder %s606_s16, %s606_s16 }
  0x22   :  { %532 = vmatprep.mubr.msk.bf16.mxu0 %vm677_vm0, %v676_v0  ;;  %523 = vmatpush3.bf16.msra.mxu1 %v557_v5  ;;  %v402_v5 = vadd.s32 %v401_v4, %v296_v38 }
  0x23   :  { %536 = vmatprep.subr.mxu1 %v676_v0  ;;  %529 = vmatpush3.bf16.msra.mxu0 %v558_v6  ;;  %v498_v54 = vshrl.u32 %v279_v51, 16  ;;  %v679_v6 = vmov 0   ;;  %p613_p13 = por %p612_p12, %p611_p11 }
  0x24   :  { %530 = vmatprep.subr.bf16.mxu0 %v676_v0 }
  0x25   :  { %v282_v55 = vxor.u32 %v498_v54, %v279_v51  ;;  %p614_p0 = pnand %p613_p13, %p607_p10 }
  0x27   :  { %531 = vmatpush3.bf16.msra.mxu0 %v559_v15  ;;  %v283_v56 = vmul.u32 2146121005, %v282_v55 }
  0x29   :  { %v499_v57 = vshrl.u32 %v283_v56, 15 }
  0x2b   :  { %v286_v58 = vxor.u32 %v499_v57, %v283_v56 }
  0x2d   :  { %v287_v59 = vmul.u32 2221516427, %v286_v58 }
  0x2f   :  { %v500_v60 = vshrl.u32 %v287_v59, 16 }
  0x31   :  { %v290_v61 = vxor.u32 %v500_v60, %v287_v59 }
  0x33   :  { %v291_v62 = vand.u32 8388607, %v290_v61 }
  0x35   :  { %v292_v63 = vcvt.s32.f32 %v291_v62 }
  0xe1   :  { %v113_v8 = vpop.f32.mrf.mxu0 }
  0xe2   :  { %v114_v9 = vadd.f32 %v487_v7, %v113_v8 }
  0xe3   :  { %v518_v10 = vpop.f32.mrf.mxu0 }
  0xe4   :  { %v119_v11 = vmax.f32 %v114_v9, 0.0 }
  0xe5   :  { %v116_v12 = vpop.f32.mrf.mxu0 }
  0xe6   :  { %v120_v13 = vpack.c.bf16 %v119_v11, %v119_v11 }
  0xe7   :  { %v519_v14 = vpop.f32.mrf.mxu0 }
  0xe8   :  { %525 = vmatmul.mubr.msk.bf16.vlgmr.msra.gmra.mxu1 %vm144_vm2, %v120_v13 }
  0xe9   :  { %538 = vmatprep.mubr.msk.f32.mxu1 %vm677_vm0, %v676_v0  ;;  %537 = vmatpush3.msk.msra.mxu1 %vm297_vm4, %v678_v39  ;;  %v293_v0 = vmul.f32 1.1920929e-07, %v292_v63 }
  0xeb   :  { %v294_v2 = vadd.f32 5.9604645e-08, %v293_v0 }
 0x1a8   :  { %v182_v17 = vpop.f32.mrf.mxu1 }
 0x1a9   :  { %v183_v18 = vadd.f32 %v490_v16, %v182_v17 }
 0x1aa   :  { %v526_v19 = vpop.f32.mrf.mxu1 }
 0x1ab   :  { %v188_v20 = vmax.f32 %v183_v18, 0.0 }
 0x1ac   :  { %v185_v21 = vpop.f32.mrf.mxu1 }
 0x1ad   :  { %v189_v22 = vpack.c.bf16 %v188_v20, %v188_v20 }
 0x1ae   :  { %v527_v23 = vpop.f32.mrf.mxu1 }
 0x1af   :  { %533 = vmatmul.mubr.msk.bf16.vlgmr.msra.gmra.mxu0 %vm144_vm2, %v189_v22 }
 0x26f   :  { %v250_v25 = vpop.f32.mrf.mxu0 }
 0x270   :  { %v251_v26 = vadd.f32 %v494_v24, %v250_v25 }
 0x271   :  { %v534_v27 = vpop.f32.mrf.mxu0 }
 0x272   :  { %v257_v28 = vsel %vm256_vm3, %v251_v26, -inf }
 0x273   :  { %258 = vmax.xlane.f32.xlu0 %v257_v28  ;;  %v253_v29 = vpop.f32.mrf.mxu0 }
 0x275   :  { %v535_v30 = vpop.f32.mrf.mxu0 }
 0x2fc   :  { %v259_v31 = vpop.xlane.xlu0 %258 }
 0x2fd   :  { %v771_v32 = vsub.f32 %v251_v26, %v259_v31 }
 0x2ff   :  { %v261_v33 = vmul.f32 1.442695, %v771_v32 }
 0x301   :  { %560 = vpow2.f32 %v261_v33 }
 0x30e   :  { %v561_v34 = vpop.eup %560 }
 0x30f   :  { %v263_v35 = vsel %vm256_vm3, %v561_v34, 0.0 }
 0x310   :  { %264 = vadd.xlane.f32.xlu0 %v263_v35 }
 0x399   :  { %v265_v40 = vpop.xlane.xlu0 %264 }
 0x39a   :  { %562 = vrcp.f32 %v265_v40 }
 0x39b   :  { %564 = vlog2.f32 %v265_v40 }
 0x3a7   :  { %v563_v41 = vpop.eup %562 }
 0x3a8   :  { %v267_v42 = vmul.f32 %v563_v41, %v561_v34  ;;  %v565_v16 = vpop.eup %564 }
 0x3a9   :  { %v269_v17 = vmul.f32 0.6931472, %v565_v16 }
 0x3aa   :  { %539 = vmatmul.mubr.msk.f32.vlgmr.msra.gmra.mxu1 %vm300_vm5, %v267_v42  ;;  %391 = vst.msk [vmem:[#allocation9] sm:$0x3] %vm256_vm3, %v267_v42  ;;  %v403_v43 = vsel %vm256_vm3, %v267_v42, -inf }
 0x3ab   :  { %404 = vmax.xlane.f32.xlu1 %v403_v43  ;;  %v270_v18 = vsub.f32 %v771_v32, %v269_v17 }
 0x434   :  { %v405_v44 = vpop.xlane.xlu1 %404 }
 0x435   :  { %v406_v45 = vrot.slane %v405_v44, 4 }
 0x437   :  { %v407_v46 = vmax.f32 %v405_v44, %v406_v45 }
 0x439   :  { %v408_v48 = vrot.slane %v407_v46, 2 }
 0x43b   :  { %v409_v50 = vmax.f32 %v407_v46, %v408_v48 }
 0x43d   :  { %v410_v52 = vrot.slane %v409_v50, 1 }
 0x43f   :  { %v411_v53 = vmax.f32 %v409_v50, %v410_v52 }
 0x441   :  { %541 = vpush %v411_v53 }
 0x46a   :  { %v370_v1 = vpop.f32.mrf.mxu1 }
 0x46b   :  { %vm374_vm6 = vcmp.gt.f32.partialorder %v294_v2, %v370_v1 }
 0x46c   :  { %v540_v3 = vpop.f32.mrf.mxu1  ;;  %v375_v7 = vsel %vm374_vm6, 1, %v679_v6 }
 0x46d   :  { %v376_v10 = vsel %vm256_vm3, %v375_v7, 0 }
 0x46e   :  { %v378_v14 = vshrl.u32 %v376_v10, 16  ;;  %v377_v22 = vand.u32 65535, %v376_v10 }
 0x470   :  { %v380_v15 = vcvt.s32.f32 %v378_v14  ;;  %v379_v25 = vcvt.s32.f32 %v377_v22 }
 0x472   :  { %s542_s0 = spop %541 }
 0x473   :  { %v413_v8 = vstv %s542_s0 }
 0x474   :  { %vm414_vm7 = vcmp.ge.f32.partialorder %v267_v42, %v413_v8  ;;  %441 = vst [vmem:[#allocation10] sm:$0xff] %v413_v8 }
 0x475   :  { %v415_v9 = vsel %vm414_vm7, %v402_v5, 16 }
 0x476   :  { %v416_v11 = vsel %vm256_vm3, %v415_v9, 2147483647 }
 0x477   :  { %v418_v12 = vshra.s32 %v416_v11, 16  ;;  %v417_v19 = vand.u32 65535, %v416_v11 }
 0x479   :  { %v420_v13 = vcvt.s32.f32 %v418_v12  ;;  %v419_v21 = vcvt.s32.f32 %v417_v19 }
 0x47b   :  { %421 = vmin.xlane.f32.xlu1 %v420_v13 }
 0x47f   :  { %383 = vadd.xlane.f32.xlu1 %v380_v15 }
 0x490   :  { %393 = vrot.lane.b32.xlu1 %v270_v18, %s680_s13 }
 0x504   :  { %v422_v20 = vpop.xlane.xlu1 %421 }
 0x505   :  { %vm423_vm8 = vcmp.eq.f32.partialorder %v420_v13, %v422_v20 }
 0x506   :  { %v424_v23 = vsel %vm423_vm8, %v419_v21, inf }
 0x507   :  { %425 = vmin.xlane.f32.xlu0 %v424_v23 }
 0x508   :  { %v384_v24 = vpop.xlane.xlu1 %383 }
 0x50b   :  { %381 = vadd.xlane.f32.xlu0 %v379_v25 }
 0x50c   :  { %v394_v26 = vpop.permute.xlu1 %393 }
 0x50d   :  { %397 = vst.msk [vmem:[#allocation9] sm:$0x3] %vm396_vm9, %v394_v26 }
 0x50e   :  { %617 = shalt.err (!%p614_p0)
}
 0x50f   :  { %463 = dma.vmem_to_hbm [thread:$0]  %s461_s15, 128, %s801_s9, [#allocation11]   ;;  %v428_v27 = vcvt.f32.s32 %v422_v20  ;;  %v386_v30 = vcvt.f32.s32 %v384_v24  ;;  %vm399_vm12 = vcmask 132224  }
 0x510   :  { %s682_s19 = smov [#allocation9]  }
 0x511   :  { %v429_v29 = vshll.u32 %v428_v27, 16  ;;  %v387_v34 = vshll.u32 %v386_v30, 16  ;;  %s450_s20 = sshll.u32 %s682_s19, 4  ;;  %s451_s20 = int_to_ptr.vmem [resolvable:$true] %s450_s20 }
 0x512   :  { %s626_s9 = scalar_lea.vmem %s451_s20, 32  ;;  %p631_p2 = scmp.lt.s32.totalorder %s451_s20, %s451_s20 }
 0x513   :  { %p627_p1 = scmp.ne.s32.totalorder %s451_s20, %s626_s9  ;;  %p632_p3 = scmp.lt.s32.totalorder %s626_s9, %s626_s9 }
 0x515   :  { %p633_p4 = por %p632_p3, %p631_p2 }
 0x517   :  { %p634_p5 = pnand %p633_p4, %p627_p1 }
 0x590   :  { %v426_v28 = vpop.xlane.xlu0 %425 }
 0x591   :  { %v427_v31 = vcvt.f32.s32 %v426_v28 }
 0x593   :  { %v430_v32 = vadd.s32 %v429_v29, %v427_v31 }
 0x594   :  { %v382_v33 = vpop.xlane.xlu0 %381 }
 0x595   :  { %v431_v35 = vrot.slane %v430_v32, 4  ;;  %v385_v36 = vcvt.f32.s32 %v382_v33 }
 0x597   :  { %vm432_vm10 = vcmp.lt.s32.totalorder %v430_v32, %v431_v35  ;;  %v388_v37 = vadd.s32 %v387_v34, %v385_v36 }
 0x598   :  { %v433_v38 = vsel %vm432_vm10, %v430_v32, %v431_v35 }
 0x599   :  { %vm389_vm11 = vcmp.lt.s32.totalorder %v388_v37, 7  ;;  %v434_v39 = vrot.slane %v433_v38, 2 }
 0x59a   :  { %v390_v40 = vsel %vm389_vm11, %v388_v37, 7 }
 0x59b   :  { %v398_v41 = vcvt.s32.f32 %v390_v40  ;;  %vm435_vm13 = vcmp.lt.s32.totalorder %v433_v38, %v434_v39 }
 0x59c   :  { %v436_v42 = vsel %vm435_vm13, %v433_v38, %v434_v39 }
 0x59d   :  { %v437_v43 = vrot.slane %v436_v42, 1  ;;  %400 = vst.msk [vmem:[#allocation9] sm:$0x3] %vm399_vm12, %v398_v41 }
 0x59e   :  { %637 = shalt.err (!%p634_p5)
}
 0x59f   :  { %453 = dma.vmem_to_hbm [thread:$0]  %s451_s20, 32, %s800_s8, [#allocation6]   ;;  %vm438_vm14 = vcmp.lt.s32.totalorder %v436_v42, %v437_v43 }
 0x5a0   :  { %v439_v44 = vsel %vm438_vm14, %v436_v42, %v437_v43  ;;  %s683_s23 = smov [#allocation12]  }
 0x5a1   :  { %543 = vpush %v439_v44  ;;  %s470_s1 = sshll.u32 %s683_s23, 4  ;;  %s471_s1 = int_to_ptr.vmem [resolvable:$true] %s470_s1 }
 0x5a2   :  { %s646_s5 = scalar_lea.vmem %s471_s1, 128  ;;  %p651_p7 = scmp.lt.s32.totalorder %s471_s1, %s471_s1 }
 0x5a3   :  { %p647_p6 = scmp.ne.s32.totalorder %s471_s1, %s646_s5  ;;  %p652_p8 = scmp.lt.s32.totalorder %s646_s5, %s646_s5 }
 0x5a5   :  { %p653_p9 = por %p652_p8, %p651_p7 }
 0x5a7   :  { %p654_p10 = pnand %p653_p9, %p647_p6 }
 0x5d2   :  { %s544_s24 = spop %543 }
 0x5d3   :  { %v442_v45 = vstv %s544_s24 }
 0x5d4   :  { %443 = vst [vmem:[#allocation12] sm:$0xff] %v442_v45 }
 0x5d5   :  { %657 = shalt.err (!%p654_p10)
}
 0x5d6   :  { %473 = dma.vmem_to_hbm [thread:$0]  %s471_s1, 128, %s802_s10, [#allocation11]  }
 0x5d7   :  { %670 = dma.done.wait [#allocation6], 32  }
 0x5d8   :  { %671 = vsyncadd [#allocation6], 4294967264 }
 0x5d9   :  { %672 = dma.done.wait [#allocation11], 256  }
 0x5da   :  { %673 = vsyncadd [#allocation11], 4294967040 }
 0x5db   :  { %483 = vsyncpa [#allocation5], 1 }
 0x5dc   :  { %484 = vsyncpa [#allocation8], 1 }
 0x5dd   :  { %485 = vsyncpa [#allocation6], 1 }
 0x5de   :  { %486 = vsyncpa [#allocation11], 1 }

</bundles_post_ra>
